<compile_context>
chip_gen: v7x
topology: tpu7x:2x2x1
jax: 0.10.0
libtpu: 0.0.40
codegen_flags: <defaults>
</compile_context>

<pallas_src>
import jax
import jax.numpy as jnp
import numpy as np
from jax.experimental import pallas as pl
from jax.experimental.pallas import tpu as pltpu

K_MODELS = 3                 # number of models being "souped"
NUM_PARAMS = 4               # (W1, b1, W2, b2)
D_IN, D_HID, D_OUT = 32, 64, 16
BATCH = 2

LANES = 128                  # lane-dense slab width (padded hidden / out dims)
OUT_PAD = 128                # output 16 -> 128 lanes (zero padded)
B_PAD = 8                    # batch 2 -> 8 sublanes (zero padded)

# Per-model slab row layout (weight blocks 8-sublane aligned, biases 1 row each):
W1T_OFF, W1T_ROWS = 0, D_IN        # rows [ 0, 32): W1.T (32,64) in cols [0,64)
W2T_OFF, W2T_ROWS = 32, D_HID      # rows [32, 96): W2.T (64,16) in cols [0,16)
B1_ROW = 96                        # row  96      : b1 in cols [0,64)
B2_ROW = 97                        # row  97      : b2 in cols [0,16)
SLAB_ROWS = 104                    # pad to a multiple of 8 sublanes


# ---------------------------------------------------------------------------
# Construction-time packing (hoisted out of the forward path)
# ---------------------------------------------------------------------------
def pack_paramslist(paramslist):
    """Pack K candidate models' (W1, b1, W2, b2) into a single lane-dense
    (K, SLAB_ROWS, 128) f32 slab with pre-transposed, zero-padded weights."""
    slabs = []
    for (w1, b1, w2, b2) in paramslist:
        s = np.zeros((SLAB_ROWS, LANES), np.float32)
        s[W1T_OFF:W1T_OFF + D_IN, :D_HID] = np.asarray(w1, np.float32).T   # (32,64)
        s[W2T_OFF:W2T_OFF + D_HID, :D_OUT] = np.asarray(w2, np.float32).T  # (64,16)
        s[B1_ROW, :D_HID] = np.asarray(b1, np.float32).reshape(D_HID)
        s[B2_ROW, :D_OUT] = np.asarray(b2, np.float32).reshape(D_OUT)
        slabs.append(s)
    return jnp.asarray(np.stack(slabs, axis=0))                            # (K,104,128)


def prepare_merge_scales(alpha_raw, beta):
    """softmax(alpha) merge weights with beta folded into the layer-2 params
    (beta*(h@W2.T+b2) == h@(beta*W2).T + beta*b2).  Hoisted out of the
    per-call forward; recompute only when alpha_raw / beta change."""
    alph = jax.nn.softmax(alpha_raw.astype(jnp.float32), axis=1)   # (NUM_PARAMS, K)
    fold = jnp.concatenate([jnp.ones((2,), jnp.float32),
                            jnp.broadcast_to(beta, (2,)).astype(jnp.float32)])
    # scales[k*NUM_PARAMS + j] = softmax(alpha)[j, k] * fold[j]
    return (alph * fold[:, None]).T.reshape(-1)                    # (K*NUM_PARAMS,)


def pad_input(x):
    """Zero-pad the batch to 8 sublanes (hoisted out of the jitted forward)."""
    b = x.shape[0]
    return jnp.zeros((B_PAD, D_IN), jnp.float32).at[:b, :].set(x.astype(jnp.float32))


# ---------------------------------------------------------------------------
# Fused kernel: alpha-weighted merge + MLP forward (beta folded into scales)
# ---------------------------------------------------------------------------
def fused_soup_mlp_kernel(scales_ref, x_ref, slab_ref, o_ref):
    """scales_ref: (K*NUM_PARAMS,) f32 SMEM -- scales[k*4+j] = softmax(alpha)[j,k],
                   with beta already folded into j=2 (W2) and j=3 (b2).
       x_ref:      (B_PAD, D_IN)         f32 VMEM
       slab_ref:   (K, SLAB_ROWS, 128)   f32 VMEM (packed, pre-transposed params)
       o_ref:      (B_PAD, 128)          f32 VMEM (lane-dense).
       NOTE: lanes >= D_OUT of o_ref are exactly zero, but rows >= the real
       batch contain ReLU(b1)@W2T+b2 garbage -- callers must slice [:batch]."""

    def merged(row0, nrows, j):
        acc = slab_ref[0, pl.ds(row0, nrows), :] * scales_ref[0 * NUM_PARAMS + j]
        for k in range(1, K_MODELS):                       # static, tiny trip count
            acc = acc + slab_ref[k, pl.ds(row0, nrows), :] * scales_ref[k * NUM_PARAMS + j]
        return acc

    w1t = merged(W1T_OFF, W1T_ROWS, 0)    # (32, 128)  pre-transposed, lane padded
    b1 = merged(B1_ROW, 1, 1)             # (1, 128)   broadcast over sublanes below
    w2t = merged(W2T_OFF, W2T_ROWS, 2)    # (64, 128)  beta already folded in
    b2 = merged(B2_ROW, 1, 3)             # (1, 128)   beta already folded in

    h = jnp.dot(x_ref[...], w1t, preferred_element_type=jnp.float32) + b1
    h = jnp.maximum(h, 0.0)                                # ReLU; lanes >= 64 are 0
    # Contract only the real hidden dim (W2T no longer carries zero rows).
    o_ref[...] = jnp.dot(h[:, :D_HID], w2t, preferred_element_type=jnp.float32) + b2


# ---------------------------------------------------------------------------
# AlphaWrapper.forward equivalent (jitted body is exactly one pallas_call)
# ---------------------------------------------------------------------------
@jax.jit
def alpha_wrapper_forward(stacked_slab, merge_scales, x_pad):
    return pl.pallas_call(
        fused_soup_mlp_kernel,
        out_shape=jax.ShapeDtypeStruct((B_PAD, OUT_PAD), jnp.float32),
        in_specs=[
            pl.BlockSpec(memory_space=pltpu.SMEM),   # merge scales (scalars)
            pl.BlockSpec(memory_space=pltpu.VMEM),   # x_pad        (8, 32)
            pl.BlockSpec(memory_space=pltpu.VMEM),   # param slab   (K, 104, 128)
        ],
        out_specs=pl.BlockSpec(memory_space=pltpu.VMEM),
    )(merge_scales, x_pad, stacked_slab)


# ---------------------------------------------------------------------------
# Pure-JAX reference (semantics of the PyTorch module) for a sanity check
# ---------------------------------------------------------------------------
def reference_forward(paramslist, alpha_raw, beta, x):
    alph = jax.nn.softmax(alpha_raw, axis=1)
    merged = []
    for j, p in enumerate(zip(*paramslist)):
        merged.append(sum(pi * alph[j, i] for i, pi in enumerate(p)))
    w1, b1, w2, b2 = merged
    h = jnp.maximum(x @ w1.T + b1, 0.0)
    y = h @ w2.T + b2
    return beta * y


if __name__ == "__main__":
    key = jax.random.PRNGKey(0)

    # Deterministically build K candidate-model parameter tuples.
    # Each tuple: (W1 (64,32), b1 (1,64), W2 (16,64), b2 (1,16))  [biases kept 2D]
    paramslist = []
    for i in range(K_MODELS):
        key, k1, k2, k3, k4 = jax.random.split(key, 5)
        w1 = jax.random.normal(k1, (D_HID, D_IN), jnp.float32) / np.sqrt(D_IN)
        b1 = jax.random.normal(k2, (1, D_HID), jnp.float32) * 0.1
        w2 = jax.random.normal(k3, (D_OUT, D_HID), jnp.float32) / np.sqrt(D_HID)
        b2 = jax.random.normal(k4, (1, D_OUT), jnp.float32) * 0.1
        paramslist.append((w1, b1, w2, b2))
    paramslist = tuple(paramslist)

    # --- construction-time work (hoisted out of the per-call forward) ---
    stacked_slab = pack_paramslist(paramslist)              # (K, 104, 128) f32

    # AlphaWrapper learnable parameters, exactly as __init__ does:
    # alpha_raw = softmax(ones) (softmaxed AGAIN inside alpha()); beta = 1.0.
    alpha_raw = jax.nn.softmax(jnp.ones((NUM_PARAMS, K_MODELS), jnp.float32), axis=1)
    beta = jnp.asarray(1.0, jnp.float32)

    merge_scales = prepare_merge_scales(alpha_raw, beta)    # (K*NUM_PARAMS,)

    # Input
    key, kx = jax.random.split(key)
    x = jax.random.normal(kx, (BATCH, D_IN), jnp.float32)
    x_pad = pad_input(x)

    # --- forward: one fused Pallas kernel ---
    out_pad = alpha_wrapper_forward(stacked_slab, merge_scales, x_pad)
    out_pad = jax.block_until_ready(out_pad)
    out = out_pad[:BATCH, :D_OUT]                           # strip padding (caller-side)

    ref = reference_forward(paramslist, alpha_raw, beta, x)
    np.testing.assert_allclose(np.asarray(out), np.asarray(ref),
                               rtol=1e-5, atol=1e-5)

    print("KERNEL_OK")
</pallas_src>

<mosaic_0001>
module attributes {stable_mosaic.version = 11 : i64} {
  func.func @fused_soup_mlp_kernel(%arg0: memref<12xf32, #tpu.memory_space<smem>>, %arg1: memref<8x32xf32, #tpu.memory_space<vmem>>, %arg2: memref<3x104x128xf32, #tpu.memory_space<vmem>>, %arg3: memref<8x128xf32, #tpu.memory_space<vmem>>) attributes {dimension_semantics = [], scalar_prefetch = 0 : i64, scratch_operands = 0 : i64, tpu.core_type = #tpu.core_type<tc>} {
    %c0 = arith.constant 0 : index
    %c0_0 = arith.constant 0 : index
    %c0_1 = arith.constant 0 : index
    %0 = vector.load %arg2[%c0, %c0_0, %c0_1] : memref<3x104x128xf32, #tpu.memory_space<vmem>>, vector<1x32x128xf32>
    %1 = vector.shape_cast %0 : vector<1x32x128xf32> to vector<32x128xf32>
    %c0_2 = arith.constant 0 : index
    %2 = memref.load %arg0[%c0_2] : memref<12xf32, #tpu.memory_space<smem>>
    %3 = vector.broadcast %2 : f32 to vector<32x128xf32>
    %4 = arith.mulf %1, %3 : vector<32x128xf32>
    %c1 = arith.constant 1 : index
    %c0_3 = arith.constant 0 : index
    %c0_4 = arith.constant 0 : index
    %5 = vector.load %arg2[%c1, %c0_3, %c0_4] : memref<3x104x128xf32, #tpu.memory_space<vmem>>, vector<1x32x128xf32>
    %6 = vector.shape_cast %5 : vector<1x32x128xf32> to vector<32x128xf32>
    %c4 = arith.constant 4 : index
    %7 = memref.load %arg0[%c4] : memref<12xf32, #tpu.memory_space<smem>>
    %8 = vector.broadcast %7 : f32 to vector<32x128xf32>
    %9 = arith.mulf %6, %8 : vector<32x128xf32>
    %10 = arith.addf %4, %9 : vector<32x128xf32>
    %c2 = arith.constant 2 : index
    %c0_5 = arith.constant 0 : index
    %c0_6 = arith.constant 0 : index
    %11 = vector.load %arg2[%c2, %c0_5, %c0_6] : memref<3x104x128xf32, #tpu.memory_space<vmem>>, vector<1x32x128xf32>
    %12 = vector.shape_cast %11 : vector<1x32x128xf32> to vector<32x128xf32>
    %c8 = arith.constant 8 : index
    %13 = memref.load %arg0[%c8] : memref<12xf32, #tpu.memory_space<smem>>
    %14 = vector.broadcast %13 : f32 to vector<32x128xf32>
    %15 = arith.mulf %12, %14 : vector<32x128xf32>
    %16 = arith.addf %10, %15 : vector<32x128xf32>
    %c0_7 = arith.constant 0 : index
    %c96 = arith.constant 96 : index
    %c0_8 = arith.constant 0 : index
    %17 = vector.load %arg2[%c0_7, %c96, %c0_8] : memref<3x104x128xf32, #tpu.memory_space<vmem>>, vector<1x1x128xf32>
    %18 = vector.shape_cast %17 : vector<1x1x128xf32> to vector<1x128xf32>
    %c1_9 = arith.constant 1 : index
    %19 = memref.load %arg0[%c1_9] : memref<12xf32, #tpu.memory_space<smem>>
    %20 = vector.broadcast %19 : f32 to vector<1x128xf32>
    %21 = arith.mulf %18, %20 : vector<1x128xf32>
    %c1_10 = arith.constant 1 : index
    %c96_11 = arith.constant 96 : index
    %c0_12 = arith.constant 0 : index
    %22 = vector.load %arg2[%c1_10, %c96_11, %c0_12] : memref<3x104x128xf32, #tpu.memory_space<vmem>>, vector<1x1x128xf32>
    %23 = vector.shape_cast %22 : vector<1x1x128xf32> to vector<1x128xf32>
    %c5 = arith.constant 5 : index
    %24 = memref.load %arg0[%c5] : memref<12xf32, #tpu.memory_space<smem>>
    %25 = vector.broadcast %24 : f32 to vector<1x128xf32>
    %26 = arith.mulf %23, %25 : vector<1x128xf32>
    %27 = arith.addf %21, %26 : vector<1x128xf32>
    %c2_13 = arith.constant 2 : index
    %c96_14 = arith.constant 96 : index
    %c0_15 = arith.constant 0 : index
    %28 = vector.load %arg2[%c2_13, %c96_14, %c0_15] : memref<3x104x128xf32, #tpu.memory_space<vmem>>, vector<1x1x128xf32>
    %29 = vector.shape_cast %28 : vector<1x1x128xf32> to vector<1x128xf32>
    %c9 = arith.constant 9 : index
    %30 = memref.load %arg0[%c9] : memref<12xf32, #tpu.memory_space<smem>>
    %31 = vector.broadcast %30 : f32 to vector<1x128xf32>
    %32 = arith.mulf %29, %31 : vector<1x128xf32>
    %33 = arith.addf %27, %32 : vector<1x128xf32>
    %c0_16 = arith.constant 0 : index
    %c32 = arith.constant 32 : index
    %c0_17 = arith.constant 0 : index
    %34 = vector.load %arg2[%c0_16, %c32, %c0_17] : memref<3x104x128xf32, #tpu.memory_space<vmem>>, vector<1x64x128xf32>
    %35 = vector.shape_cast %34 : vector<1x64x128xf32> to vector<64x128xf32>
    %c2_18 = arith.constant 2 : index
    %36 = memref.load %arg0[%c2_18] : memref<12xf32, #tpu.memory_space<smem>>
    %37 = vector.broadcast %36 : f32 to vector<64x128xf32>
    %38 = arith.mulf %35, %37 : vector<64x128xf32>
    %c1_19 = arith.constant 1 : index
    %c32_20 = arith.constant 32 : index
    %c0_21 = arith.constant 0 : index
    %39 = vector.load %arg2[%c1_19, %c32_20, %c0_21] : memref<3x104x128xf32, #tpu.memory_space<vmem>>, vector<1x64x128xf32>
    %40 = vector.shape_cast %39 : vector<1x64x128xf32> to vector<64x128xf32>
    %c6 = arith.constant 6 : index
    %41 = memref.load %arg0[%c6] : memref<12xf32, #tpu.memory_space<smem>>
    %42 = vector.broadcast %41 : f32 to vector<64x128xf32>
    %43 = arith.mulf %40, %42 : vector<64x128xf32>
    %44 = arith.addf %38, %43 : vector<64x128xf32>
    %c2_22 = arith.constant 2 : index
    %c32_23 = arith.constant 32 : index
    %c0_24 = arith.constant 0 : index
    %45 = vector.load %arg2[%c2_22, %c32_23, %c0_24] : memref<3x104x128xf32, #tpu.memory_space<vmem>>, vector<1x64x128xf32>
    %46 = vector.shape_cast %45 : vector<1x64x128xf32> to vector<64x128xf32>
    %c10 = arith.constant 10 : index
    %47 = memref.load %arg0[%c10] : memref<12xf32, #tpu.memory_space<smem>>
    %48 = vector.broadcast %47 : f32 to vector<64x128xf32>
    %49 = arith.mulf %46, %48 : vector<64x128xf32>
    %50 = arith.addf %44, %49 : vector<64x128xf32>
    %c0_25 = arith.constant 0 : index
    %c97 = arith.constant 97 : index
    %c0_26 = arith.constant 0 : index
    %51 = vector.load %arg2[%c0_25, %c97, %c0_26] : memref<3x104x128xf32, #tpu.memory_space<vmem>>, vector<1x1x128xf32>
    %52 = vector.shape_cast %51 : vector<1x1x128xf32> to vector<1x128xf32>
    %c3 = arith.constant 3 : index
    %53 = memref.load %arg0[%c3] : memref<12xf32, #tpu.memory_space<smem>>
    %54 = vector.broadcast %53 : f32 to vector<1x128xf32>
    %55 = arith.mulf %52, %54 : vector<1x128xf32>
    %c1_27 = arith.constant 1 : index
    %c97_28 = arith.constant 97 : index
    %c0_29 = arith.constant 0 : index
    %56 = vector.load %arg2[%c1_27, %c97_28, %c0_29] : memref<3x104x128xf32, #tpu.memory_space<vmem>>, vector<1x1x128xf32>
    %57 = vector.shape_cast %56 : vector<1x1x128xf32> to vector<1x128xf32>
    %c7 = arith.constant 7 : index
    %58 = memref.load %arg0[%c7] : memref<12xf32, #tpu.memory_space<smem>>
    %59 = vector.broadcast %58 : f32 to vector<1x128xf32>
    %60 = arith.mulf %57, %59 : vector<1x128xf32>
    %61 = arith.addf %55, %60 : vector<1x128xf32>
    %c2_30 = arith.constant 2 : index
    %c97_31 = arith.constant 97 : index
    %c0_32 = arith.constant 0 : index
    %62 = vector.load %arg2[%c2_30, %c97_31, %c0_32] : memref<3x104x128xf32, #tpu.memory_space<vmem>>, vector<1x1x128xf32>
    %63 = vector.shape_cast %62 : vector<1x1x128xf32> to vector<1x128xf32>
    %c11 = arith.constant 11 : index
    %64 = memref.load %arg0[%c11] : memref<12xf32, #tpu.memory_space<smem>>
    %65 = vector.broadcast %64 : f32 to vector<1x128xf32>
    %66 = arith.mulf %63, %65 : vector<1x128xf32>
    %67 = arith.addf %61, %66 : vector<1x128xf32>
    %c0_33 = arith.constant 0 : index
    %c0_34 = arith.constant 0 : index
    %68 = vector.load %arg1[%c0_33, %c0_34] : memref<8x32xf32, #tpu.memory_space<vmem>>, vector<8x32xf32>
    %cst = arith.constant dense<0.000000e+00> : vector<8x128xf32>
    %69 = tpu.matmul %68, %16, %cst {dimension_numbers = #tpu.dot_dimension_numbers<[1], [0], [0], [1], [0, 0, 1, 1], [], []>} : vector<8x32xf32>, vector<32x128xf32>, vector<8x128xf32> -> vector<8x128xf32>
    %70 = vector.broadcast %33 : vector<1x128xf32> to vector<8x128xf32>
    %71 = arith.addf %69, %70 : vector<8x128xf32>
    %cst_35 = arith.constant 0.000000e+00 : f32
    %72 = vector.broadcast %cst_35 : f32 to vector<8x128xf32>
    %73 = arith.maximumf %71, %72 : vector<8x128xf32>
    %74 = vector.extract_strided_slice %73 {offsets = [0, 0], sizes = [8, 64], strides = [1, 1]} : vector<8x128xf32> to vector<8x64xf32>
    %cst_36 = arith.constant dense<0.000000e+00> : vector<8x128xf32>
    %75 = tpu.matmul %74, %50, %cst_36 {dimension_numbers = #tpu.dot_dimension_numbers<[1], [0], [0], [1], [0, 0, 1, 1], [], []>} : vector<8x64xf32>, vector<64x128xf32>, vector<8x128xf32> -> vector<8x128xf32>
    %76 = vector.broadcast %67 : vector<1x128xf32> to vector<8x128xf32>
    %77 = arith.addf %75, %76 : vector<8x128xf32>
    %c0_37 = arith.constant 0 : index
    %c0_38 = arith.constant 0 : index
    %78 = vector.load %arg3[%c0_37, %c0_38] : memref<8x128xf32, #tpu.memory_space<vmem>>, vector<8x128xf32>
    tpu.vector_store %arg3[%c0_37, %c0_38], %77 {strides = array<i32>} : memref<8x128xf32, #tpu.memory_space<vmem>>, vector<8x128xf32>,
    return
  }
}

</mosaic_0001>

<bundles_post_ra>
// kernel: alpha_wrapper_forward.1
= control target key start
LH: loop header
LB: loop body
LE: loop exit
PB: predicated region body
PF: predicated region fallthrough
CT: control target
= control target key end

     0   :  { %8 = vsyncpa [#allocation5], 0  ;;  %s641_s0 = inlined_call_operand.vmem [shape: f32[12], index: 0, kind: input, shape index: {}]   ;;  %s642_s1 = inlined_call_operand.hbm [shape: f32[8,32], index: 1, kind: input, shape index: {}]   ;;  %s643_s2 = inlined_call_operand.hbm [shape: f32[3,104,128], index: 2, kind: input, shape index: {}]   ;;  %s644_s3 = inlined_call_operand.hbm [shape: f32[8,128], index: 3, kind: output, shape index: {}]  }
   0x1   :  { %9 = vsyncpa [#allocation3], 0 }
   0x2   :  { %10 = vsyncpa [#allocation8], 0 }
   0x3   :  { %11 = vsyncpa [#allocation4], 0  ;;  %s18_s14 = sshll.u32 %s641_s0, 4  ;;  %s19_s14 = int_to_ptr.vmem [resolvable:$true] %s18_s14 }
   0x4   :  { %s452_s15 = scalar_lea.vmem %s19_s14, 16  ;;  %p457_p1 = scmp.lt.s32.totalorder %s19_s14, %s19_s14 }
   0x5   :  { %p453_p0 = scmp.ne.s32.totalorder %s19_s14, %s452_s15  ;;  %p458_p2 = scmp.lt.s32.totalorder %s452_s15, %s452_s15 }
   0x7   :  { %p459_p3 = por %p458_p2, %p457_p1 }
   0x9   :  { %p460_p4 = pnand %p459_p3, %p453_p0 }
   0xb   :  { %463 = shalt.err (!%p460_p4)
}
   0xc   :  { %s538_s16 = smov [#allocation2]   ;;  %s539_s17 = smov [#allocation6]  }
   0xd   :  { %21 = dma.vmem_to_smem %s19_s14, 16, %s538_s16, [#allocation5]  }
   0xe   :  { %s28_s18 = sshll.u32 %s539_s17, 4  ;;  %s540_s19 = smov [#allocation7]   ;;  %s29_s18 = int_to_ptr.vmem [resolvable:$true] %s28_s18 }
   0xf   :  { %s37_s20 = sshll.u32 %s540_s19, 4  ;;  %s464_s23 = scalar_lea.hbm %s642_s1, 128  ;;  %s38_s20 = int_to_ptr.vmem [resolvable:$true] %s37_s20 }
  0x10   :  { %p465_p5 = scmp.ne.s32.totalorder %s642_s1, %s464_s23  ;;  %p468_p6 = scmp.lt.u32.totalorder %s464_s23, %s642_s1 }
  0x12   :  { %p470_p7 = pnand %p468_p6, %p465_p5 }
  0x14   :  { %473 = shalt.err (!%p470_p7)
}
  0x15   :  { %s474_s27 = scalar_lea.vmem %s29_s18, 128  ;;  %p479_p9 = scmp.lt.s32.totalorder %s29_s18, %s29_s18 }
  0x16   :  { %p475_p8 = scmp.ne.s32.totalorder %s29_s18, %s474_s27  ;;  %p480_p10 = scmp.lt.s32.totalorder %s474_s27, %s474_s27 }
  0x18   :  { %p481_p11 = por %p480_p10, %p479_p9 }
  0x1a   :  { %p482_p12 = pnand %p481_p11, %p475_p8 }
  0x1c   :  { %485 = shalt.err (!%p482_p12)
}
  0x1d   :  { %31 = dma.hbm_to_vmem [thread:$0]  %s642_s1, 128, %s29_s18, [#allocation3]  }
  0x1e   :  { %s486_s5 = scalar_lea.hbm %s643_s2, 4992 }
  0x1f   :  { %p487_p13 = scmp.ne.s32.totalorder %s643_s2, %s486_s5  ;;  %p490_p0 = scmp.lt.u32.totalorder %s486_s5, %s643_s2 }
  0x21   :  { %p492_p1 = pnand %p490_p0, %p487_p13 }
  0x23   :  { %495 = shalt.err (!%p492_p1)
}
  0x24   :  { %s496_s10 = scalar_lea.vmem %s38_s20, 4992  ;;  %p501_p3 = scmp.lt.s32.totalorder %s38_s20, %s38_s20 }
  0x25   :  { %p497_p2 = scmp.ne.s32.totalorder %s38_s20, %s496_s10  ;;  %p502_p4 = scmp.lt.s32.totalorder %s496_s10, %s496_s10 }
  0x27   :  { %p503_p5 = por %p502_p4, %p501_p3 }
  0x29   :  { %p504_p6 = pnand %p503_p5, %p497_p2 }
  0x2b   :  { %507 = shalt.err (!%p504_p6)
}
  0x2c   :  { %s541_s1 = smov 128   ;;  %s542_s11 = smov 8  }
  0x2d   :  { %43 = dma.hbm_to_vmem [thread:$0]  %s643_s2, 4992, %s38_s20, [#allocation8], %s541_s1, %s541_s1, %s542_s11  }
  0x2e   :  { %530 = dma.done.wait [#allocation5], 16  }
  0x2f   :  { %531 = vsyncadd [#allocation5], 4294967280 }
  0x30   :  { %532 = dma.done.wait [#allocation3], 128  }
  0x31   :  { %533 = vsyncadd [#allocation3], 4294967168 }
  0x32   :  { %534 = dma.done.wait [#allocation8], 4992  }
  0x33   :  { %535 = vsyncadd [#allocation8], 4294962304 }
  0x34   :  { %53 = sfence }
  0x35   :  { %s58_s14 = sld [smem:[#allocation2]]  ;;  %v543_v0 = vmov 0.0|0.0   ;;  %s368_s15 = sld [smem:[#allocation2 + $0x4]]  ;;  %v54_v1 = vld [vmem:[#allocation7] sm:$0xff]  ;;  %vm544_vm0 = vmmov 0   ;;  %v545_v2 = vmov 0.0  }
  0x36   :  { %425 = vmatprep.subr.bf16.mxu0 %v543_v0  ;;  %431 = vmatprep.subr.bf16.mxu1 %v543_v0  ;;  %s369_s16 = sld [smem:[#allocation2 + $0x8]]  ;;  %s596_s2 = sld [smem:[#allocation2 + $0x2]]  ;;  %v55_v3 = vld [vmem:[#allocation7 + $0x8] sm:$0xff]  ;;  %v56_v5 = vld [vmem:[#allocation7 + $0x10] sm:$0xff]  ;;  %v57_v8 = vld [vmem:[#allocation7 + $0x18] sm:$0xff]  ;;  %vm197_vm1 = vcmask 261120  }
  0x37   :  { %403 = vmatprep.mubr.msk.f32.mxu0 %vm544_vm0, %v545_v2  ;;  %422 = vmatprep.mubr.msk.f32.mxu1 %vm544_vm0, %v545_v2  ;;  %v65_v4 = vld [vmem:[#allocation7 + $0x68] sm:$0xff]  ;;  %s598_s17 = sld [smem:[#allocation2 + $0x6]]  ;;  %v66_v6 = vld [vmem:[#allocation7 + $0x70] sm:$0xff]  ;;  %v81_v10 = vld [vmem:[#allocation7 + $0xd8] sm:$0xff]  ;;  %s600_s18 = sld [smem:[#allocation2 + $0xa]]  ;;  %vm276_vm2 = vcmask 523264  }
  0x38   :  { %v80_v7 = vld [vmem:[#allocation7 + $0xd0] sm:$0xff]  ;;  %v67_v11 = vld [vmem:[#allocation7 + $0x78] sm:$0xff]  ;;  %v68_v12 = vld [vmem:[#allocation7 + $0x80] sm:$0xff]  ;;  %s370_s19 = sld [smem:[#allocation2 + $0x1]]  ;;  %s371_s20 = sld [smem:[#allocation2 + $0x5]] }
  0x39   :  { %v82_v17 = vld [vmem:[#allocation7 + $0xe0] sm:$0xff]  ;;  %v83_v18 = vld [vmem:[#allocation7 + $0xe8] sm:$0xff]  ;;  %v127_v34 = vld [vmem:[#allocation7 + $0x90] sm:$0xff]  ;;  %s372_s21 = sld [smem:[#allocation2 + $0x9]]  ;;  %s376_s22 = sld [smem:[#allocation2 + $0x3]] }
  0x3a   :  { %v108_v27 = vld [vmem:[#allocation7 + $0x20] sm:$0xff]  ;;  %v109_v28 = vld [vmem:[#allocation7 + $0x28] sm:$0xff]  ;;  %v110_v39 = vld [vmem:[#allocation7 + $0x30] sm:$0xff]  ;;  %s377_s23 = sld [smem:[#allocation2 + $0x7]]  ;;  %s378_s0 = sld [smem:[#allocation2 + $0xb]] }
  0x3b   :  { %v59_v9 = vstv %s58_s14  ;;  %v70_v15 = vstv %s368_s15  ;;  %v126_v33 = vld [vmem:[#allocation7 + $0x88] sm:$0xff]  ;;  %v111_v40 = vld [vmem:[#allocation7 + $0x38] sm:$0xff]  ;;  %v152_v45 = vld [vmem:[#allocation7 + $0xf0] sm:$0xff]  ;;  %s546_s24 = smov [#allocation9]  }
  0x3c   :  { %v60_v13 = vmul.f32 %v59_v9, %v54_v1  ;;  %v61_v14 = vmul.f32 %v59_v9, %v55_v3  ;;  %v62_v16 = vmul.f32 %v59_v9, %v56_v5  ;;  %v71_v19 = vmul.f32 %v70_v15, %v65_v4  ;;  %v153_v46 = vld [vmem:[#allocation7 + $0xf8] sm:$0xff]  ;;  %v129_v52 = vld [vmem:[#allocation7 + $0xa0] sm:$0xff]  ;;  %v155_v58 = vld [vmem:[#allocation7 + $0x108] sm:$0xff]  ;;  %s357_s25 = sshll.u32 %s546_s24, 4  ;;  %s358_s25 = int_to_ptr.vmem [resolvable:$true] %s357_s25 }
  0x3d   :  { %v72_v20 = vmul.f32 %v70_v15, %v66_v6  ;;  %v85_v21 = vstv %s369_s16  ;;  %v63_v22 = vmul.f32 %v59_v9, %v57_v8  ;;  %v73_v25 = vmul.f32 %v70_v15, %v67_v11  ;;  %v128_v51 = vld [vmem:[#allocation7 + $0x98] sm:$0xff]  ;;  %v154_v53 = vld [vmem:[#allocation7 + $0x100] sm:$0xff]  ;;  %v113_v60 = vld [vmem:[#allocation7 + $0x48] sm:$0xff]  ;;  %s508_s26 = scalar_lea.vmem %s358_s25, 128  ;;  %p513_p8 = scmp.lt.s32.totalorder %s358_s25, %s358_s25 }
  0x3e   :  { %v86_v23 = vmul.f32 %v85_v21, %v80_v7  ;;  %v87_v24 = vmul.f32 %v85_v21, %v81_v10  ;;  %v74_v26 = vmul.f32 %v70_v15, %v68_v12  ;;  %v75_v29 = vadd.f32 %v71_v19, %v60_v13  ;;  %v112_v59 = vld [vmem:[#allocation7 + $0x40] sm:$0xff]  ;;  %v130_v2 = vld [vmem:[#allocation7 + $0xa8] sm:$0xff]  ;;  %v131_v7 = vld [vmem:[#allocation7 + $0xb0] sm:$0xff]  ;;  %p509_p7 = scmp.ne.s32.totalorder %s358_s25, %s508_s26  ;;  %p514_p9 = scmp.lt.s32.totalorder %s508_s26, %s508_s26 }
  0x3f   :  { %v76_v30 = vadd.f32 %v72_v20, %v61_v14  ;;  %v88_v31 = vmul.f32 %v85_v21, %v82_v17  ;;  %v89_v32 = vmul.f32 %v85_v21, %v83_v18  ;;  %v77_v35 = vadd.f32 %v73_v25, %v62_v16  ;;  %v156_v8 = vld [vmem:[#allocation7 + $0x110] sm:$0xff]  ;;  %v157_v9 = vld [vmem:[#allocation7 + $0x118] sm:$0xff] }
  0x40   :  { %v78_v36 = vadd.f32 %v74_v26, %v63_v22  ;;  %v603_v37 = vstv %s596_s2  ;;  %v606_v38 = vstv %s598_s17  ;;  %v90_v41 = vadd.f32 %v86_v23, %v75_v29  ;;  %v192_v21 = vld [vmem:[#allocation6] sm:$0xff]  ;;  %p515_p10 = por %p514_p9, %p513_p8 }
  0x41   :  { %v91_v42 = vadd.f32 %v87_v24, %v76_v30  ;;  %v118_v43 = vmul.f32 %v603_v37, %v108_v27  ;;  %v119_v44 = vmul.f32 %v603_v37, %v109_v28  ;;  %v92_v47 = vadd.f32 %v88_v31, %v77_v35  ;;  %v114_v31 = vld [vmem:[#allocation7 + $0x50] sm:$0xff] }
  0x42   :  { %v93_v48 = vadd.f32 %v89_v32, %v78_v36  ;;  %v136_v49 = vmul.f32 %v606_v38, %v126_v33  ;;  %v137_v50 = vmul.f32 %v606_v38, %v127_v34  ;;  %v161_v55 = vstv %s600_s18  ;;  %v115_v32 = vld [vmem:[#allocation7 + $0x58] sm:$0xff]  ;;  %v133_v36 = vld [vmem:[#allocation7 + $0xc0] sm:$0xff]  ;;  %p516_p11 = pnand %p515_p10, %p509_p7 }
  0x43   :  { %v426_v54 = vpack.c.bf16 %v91_v42, %v90_v41  ;;  %v120_v56 = vmul.f32 %v603_v37, %v110_v39  ;;  %v121_v57 = vmul.f32 %v603_v37, %v111_v40  ;;  %v162_v1 = vmul.f32 %v161_v55, %v152_v45  ;;  %v132_v33 = vld [vmem:[#allocation7 + $0xb8] sm:$0xff]  ;;  %v158_v41 = vld [vmem:[#allocation7 + $0x120] sm:$0xff]  ;;  %v159_v42 = vld [vmem:[#allocation7 + $0x128] sm:$0xff] }
  0x44   :  { %v429_v61 = vpack.c.bf16 %v93_v48, %v92_v47  ;;  %v144_v62 = vadd.f32 %v136_v49, %v118_v43  ;;  %v145_v63 = vadd.f32 %v137_v50, %v119_v44  ;;  %v163_v3 = vmul.f32 %v161_v55, %v153_v46  ;;  %v94_v49 = vld [vmem:[#allocation7 + $0x60] sm:$0x1]  ;;  %v98_v50 = vld [vmem:[#allocation7 + $0xc8] sm:$0x1] }
  0x45   :  { %427 = vmatpush3.bf16.msra.mxu0 %v426_v54  ;;  %v138_v4 = vmul.f32 %v606_v38, %v128_v51  ;;  %v139_v5 = vmul.f32 %v606_v38, %v129_v52  ;;  %v164_v6 = vmul.f32 %v161_v55, %v154_v53  ;;  %v165_v11 = vmul.f32 %v161_v55, %v155_v58  ;;  %v103_v54 = vld [vmem:[#allocation7 + $0x130] sm:$0x1] }
  0x46   :  { %428 = vmatprep.subr.bf16.mxu0 %v543_v0  ;;  %v170_v10 = vadd.f32 %v162_v1, %v144_v62  ;;  %v122_v12 = vmul.f32 %v603_v37, %v112_v59  ;;  %v123_v13 = vmul.f32 %v603_v37, %v113_v60  ;;  %v171_v14 = vadd.f32 %v163_v3, %v145_v63  ;;  %v178_v3 = vld [vmem:[#allocation7 + $0x61] sm:$0x1] }
  0x47   :  { %v146_v15 = vadd.f32 %v138_v4, %v120_v56  ;;  %v147_v16 = vadd.f32 %v139_v5, %v121_v57  ;;  %v140_v17 = vmul.f32 %v606_v38, %v130_v2  ;;  %v141_v18 = vmul.f32 %v606_v38, %v131_v7  ;;  %v182_v5 = vld [vmem:[#allocation7 + $0xc9] sm:$0x1] }
  0x48   :  { %v166_v19 = vmul.f32 %v161_v55, %v156_v8  ;;  %v167_v20 = vmul.f32 %v161_v55, %v157_v9  ;;  %v432_v22 = vpack.c.bf16 %v171_v14, %v170_v10  ;;  %v124_v34 = vmul.f32 %v603_v37, %v114_v31  ;;  %v187_v9 = vld [vmem:[#allocation7 + $0x131] sm:$0x1] }
  0x49   :  { %430 = vmatpush3.bf16.msra.mxu0 %v429_v61  ;;  %v172_v23 = vadd.f32 %v164_v6, %v146_v15  ;;  %v173_v24 = vadd.f32 %v165_v11, %v147_v16  ;;  %v148_v25 = vadd.f32 %v140_v17, %v122_v12  ;;  %v149_v26 = vadd.f32 %v141_v18, %v123_v13 }
  0x4a   :  { %433 = vmatpush3.bf16.msra.mxu1 %v432_v22  ;;  %v125_v35 = vmul.f32 %v603_v37, %v115_v32  ;;  %v142_v39 = vmul.f32 %v606_v38, %v132_v33  ;;  %v143_v40 = vmul.f32 %v606_v38, %v133_v36  ;;  %v168_v44 = vmul.f32 %v161_v55, %v158_v41 }
  0x4b   :  { %v435_v27 = vpack.c.bf16 %v173_v24, %v172_v23  ;;  %v174_v28 = vadd.f32 %v166_v19, %v148_v25  ;;  %434 = vmatprep.subr.bf16.mxu1 %v543_v0  ;;  %v175_v29 = vadd.f32 %v167_v20, %v149_v26  ;;  %v169_v45 = vmul.f32 %v161_v55, %v159_v42 }
  0x4c   :  { %404 = vmatmul.mubr.msk.f32.vlgmr.msra.gmra.mrb[0].mxu0 %vm197_vm1, %v192_v21  ;;  %v150_v43 = vadd.f32 %v142_v39, %v124_v34  ;;  %v151_v46 = vadd.f32 %v143_v40, %v125_v35  ;;  %v96_v37 = vstv %s370_s19  ;;  %v100_v51 = vstv %s371_s20 }
  0x4d   :  { %v438_v30 = vpack.c.bf16 %v175_v29, %v174_v28  ;;  %v97_v52 = vmul.f32 %v96_v37, %v94_v49  ;;  %v101_v53 = vmul.f32 %v100_v51, %v98_v50  ;;  %v193_v38 = vlaneseq }
  0x4e   :  { %436 = vmatpush3.bf16.msra.mxu1 %v435_v27  ;;  %v176_v47 = vadd.f32 %v168_v44, %v150_v43  ;;  %v105_v56 = vstv %s372_s21  ;;  %v180_v4 = vstv %s376_s22  ;;  %v184_v6 = vstv %s377_s23 }
  0x4f   :  { %437 = vmatprep.subr.bf16.mxu1 %v543_v0  ;;  %v102_v57 = vadd.f32 %v101_v53, %v97_v52  ;;  %v106_v58 = vmul.f32 %v105_v56, %v103_v54  ;;  %v194_v55 = vshrl.u32 %v193_v38, 7  ;;  %v181_v7 = vmul.f32 %v180_v4, %v178_v3 }
  0x50   :  { %v185_v8 = vmul.f32 %v184_v6, %v182_v5  ;;  %v189_v10 = vstv %s378_s0 }
  0x51   :  { %v107_v59 = vadd.f32 %v106_v58, %v102_v57  ;;  %v195_v60 = vsub.s32 0, %v194_v55  ;;  %v190_v12 = vmul.f32 %v189_v10, %v187_v9 }
  0x52   :  { %439 = vmatpush3.bf16.msra.mxu1 %v438_v30  ;;  %v186_v11 = vadd.f32 %v185_v8, %v181_v7 }
  0x53   :  { %440 = vmatprep.subr.bf16.mxu1 %v543_v0  ;;  %v177_v0 = vadd.f32 %v169_v45, %v151_v46  ;;  %v196_v61 = vrot.slane %v107_v59, %v195_v60 }
  0x54   :  { %v191_v13 = vadd.f32 %v190_v12, %v186_v11 }
  0x55   :  { %v441_v48 = vpack.c.bf16 %v177_v0, %v176_v47 }
  0x56   :  { %v275_v14 = vrot.slane %v191_v13, %v195_v60 }
  0x57   :  { %442 = vmatpush3.bf16.msra.mxu1 %v441_v48 }
 0x11f   :  { %v267_v62 = vpop.f32.mrb[0].mxu0 }
 0x120   :  { %v268_v63 = vadd.f32 %v267_v62, %v196_v61  ;;  %v405_v1 = vpop.f32.mrb[1].mxu0 }
 0x122   :  { %v271_v2 = vmax.f32 %v268_v63, 0.0 }
 0x124   :  { %423 = vmatmul.mubr.msk.f32.vlgmr.msra.gmra.mrb[0].mxu1 %vm276_vm2, %v271_v2 }
 0x1f7   :  { %v346_v15 = vpop.f32.mrb[0].mxu1 }
 0x1f8   :  { %v347_v16 = vadd.f32 %v346_v15, %v275_v14  ;;  %v424_v17 = vpop.f32.mrb[1].mxu1 }
 0x1fa   :  { %350 = vst [vmem:[#allocation9] sm:$0xff] %v347_v16 }
 0x1fb   :  { %519 = shalt.err (!%p516_p11)
}
 0x1fc   :  { %s520_s29 = scalar_lea.hbm %s644_s3, 128 }
 0x1fd   :  { %p521_p12 = scmp.ne.s32.totalorder %s644_s3, %s520_s29  ;;  %p524_p13 = scmp.lt.u32.totalorder %s520_s29, %s644_s3 }
 0x1ff   :  { %p526_p0 = pnand %p524_p13, %p521_p12 }
 0x201   :  { %529 = shalt.err (!%p526_p0)
}
 0x202   :  { %360 = dma.vmem_to_hbm [thread:$0]  %s358_s25, 128, %s644_s3, [#allocation4]  }
 0x203   :  { %536 = dma.done.wait [#allocation4], 128  }
 0x204   :  { %537 = vsyncadd [#allocation4], 4294967168 }
 0x205   :  { %364 = vsyncpa [#allocation3], 1 }
 0x206   :  { %365 = vsyncpa [#allocation8], 1 }
 0x207   :  { %366 = vsyncpa [#allocation4], 1 }
 0x208   :  { %367 = vsyncpa [#allocation5], 1 }

</bundles_post_ra>
